<compile_context>
chip_gen: v5e
topology: v5e:2x2
jax: 0.10.0
libtpu: 0.0.40
codegen_flags: <defaults>
</compile_context>

<pallas_src>
import functools
import math

import jax
import jax.numpy as jnp
from jax.experimental import pallas as pl
from jax.experimental.pallas import tpu as pltpu


LANE = 128
SUBLANE = 8


def _round_up(x, m):
    return ((x + m - 1) // m) * m


def _pad2d(a, rows, cols):
    pr = rows - a.shape[0]
    pc = cols - a.shape[1]
    if pr or pc:
        a = jnp.pad(a, ((0, pr), (0, pc)))
    return a


def _choose_tiling(M, tm_max):
    """Pick a row tile (multiple of 8) and padded row count (multiple of tile)."""
    tm_max = max(SUBLANE, _round_up(tm_max, SUBLANE))
    m8 = _round_up(max(M, 1), SUBLANE)
    if m8 <= tm_max:
        if m8 >= 2 * SUBLANE:
            tm = _round_up(m8 // 2, SUBLANE)   # >=2 grid steps -> both v7x TCs
        else:
            tm = m8
        return tm, _round_up(m8, tm)
    return tm_max, _round_up(M, tm_max)


# ----------------------------- Pallas kernels ------------------------------

def _mlp_front_kernel(x_ref, w1t_ref, b1_ref, w2t_ref, b2_ref, o_ref, *,
                      negative_slope):
    # x_ref: (TM, INp), w1t_ref: (INp, HIDp), b1_ref: (1, HIDp),
    # w2t_ref: (HIDp, OUTp), b2_ref: (1, OUTp), o_ref: (TM, OUTp)
    h = jnp.dot(x_ref[...], w1t_ref[...],
                preferred_element_type=jnp.float32) + b1_ref[...]
    h = jnp.where(h > 0, h, negative_slope * h)            # LeakyReLU
    y = jnp.dot(h.astype(w2t_ref.dtype), w2t_ref[...],
                preferred_element_type=jnp.float32) + b2_ref[...]
    o_ref[...] = y.astype(o_ref.dtype)


def _mlp_back_kernel(x_ref, b2_ref, w2p_ref, b1_ref, w1p_ref, o_ref, *,
                     inv_negative_slope):
    # x_ref: (TM, OUTp), b2_ref: (1, OUTp), w2p_ref: (OUTp, HIDp),
    # b1_ref: (1, HIDp), w1p_ref: (HIDp, INp), o_ref: (TM, INp)
    xc = (x_ref[...].astype(jnp.float32) - b2_ref[...]).astype(w2p_ref.dtype)
    h = jnp.dot(xc, w2p_ref[...], preferred_element_type=jnp.float32)
    # inverse LeakyReLU: (x > 0) * x + (x <= 0) * x * (1 / negative_slope)
    h = jnp.where(h > 0, h, inv_negative_slope * h)
    hc = (h - b1_ref[...]).astype(w1p_ref.dtype)
    y = jnp.dot(hc, w1p_ref[...], preferred_element_type=jnp.float32)
    o_ref[...] = y.astype(o_ref.dtype)


# ------------------------------ Python module ------------------------------

class DuplexMlpPallas:
    """Pallas implementation of DuplexMlp (forward_front / forward_back)."""

    def __init__(self, in_features, hidden_features=None, out_features=None,
                 negative_slope=0.2, key=None, compute_dtype=jnp.float32):
        assert negative_slope > 0
        out_features = out_features or in_features
        hidden_features = hidden_features or in_features
        self.in_features = in_features
        self.hidden_features = hidden_features
        self.out_features = out_features
        self.negative_slope = float(negative_slope)
        self.inv_negative_slope = 1.0 / float(negative_slope)
        self.compute_dtype = jnp.dtype(compute_dtype)  # bf16 ok on v6e/v7x

        key = key if key is not None else jax.random.PRNGKey(0)
        k1, k2, k3, k4 = jax.random.split(key, 4)

        # Matches nn.Linear-style init used by DuplexLinear.reset_parameters:
        # kaiming_uniform_(a=sqrt(5))  ->  U(-1/sqrt(fan_in), 1/sqrt(fan_in))
        def linear_init(kw, kb, fan_out, fan_in):
            bound = 1.0 / math.sqrt(fan_in)
            w = jax.random.uniform(kw, (fan_out, fan_in), jnp.float32,
                                   minval=-bound, maxval=bound)
            b = jax.random.uniform(kb, (fan_out,), jnp.float32,
                                   minval=-bound, maxval=bound)
            return w, b

        self.w1, self.b1 = linear_init(k1, k2, hidden_features, in_features)
        self.w2, self.b2 = linear_init(k3, k4, out_features, hidden_features)

        # Right pseudo-inverses used by forward_back (f32 preprocessing).
        # TODO(synk): torch.inverse has no Pallas equivalent; the tiny
        # [C x C] inverses are computed in plain JAX as weight preprocessing.
        def right_pinv(w_t):  # w_t: (rows, cols) = weight.T
            return w_t.T @ jnp.linalg.inv(w_t @ w_t.T)

        self.w1_pinv = right_pinv(self.w1.T)   # (hidden, in)
        self.w2_pinv = right_pinv(self.w2.T)   # (out, hidden)

        # Lane-dense padded feature sizes (multiples of 128).
        self.in_pad = _round_up(in_features, LANE)
        self.hid_pad = _round_up(hidden_features, LANE)
        self.out_pad = _round_up(out_features, LANE)

        # Pre-transposed / pre-padded operands, hoisted out of the call path.
        cd = self.compute_dtype
        self._w1t = _pad2d(self.w1.T, self.in_pad, self.hid_pad).astype(cd)
        self._w2t = _pad2d(self.w2.T, self.hid_pad, self.out_pad).astype(cd)
        self._w2p = _pad2d(self.w2_pinv, self.out_pad, self.hid_pad).astype(cd)
        self._w1p = _pad2d(self.w1_pinv, self.hid_pad, self.in_pad).astype(cd)
        # Biases stay f32 (added to the f32 accumulator inside the kernel).
        self._b1 = _pad2d(self.b1.reshape(1, -1), 1, self.hid_pad)
        self._b2 = _pad2d(self.b2.reshape(1, -1), 1, self.out_pad)

        # TODO(synk): for very large hidden/in/out (>= ~2048) add a K-reduction
        # grid axis with a VMEM f32 accumulator instead of whole-weight tiles.

    # ------------------------------------------------------------------ #

    def _run(self, kernel, x2d, weights_and_biases, in_cols_pad, out_cols_pad,
             tm_max, flops):
        M = x2d.shape[0]
        out_dtype = x2d.dtype
        tm, M_pad = _choose_tiling(M, tm_max)

        # Pad rows to a multiple of the tile and features to the lane-dense
        # width; cast activations to the compute dtype.
        xp = _pad2d(x2d, M_pad, in_cols_pad).astype(self.compute_dtype)

        in_specs = [pl.BlockSpec((tm, in_cols_pad), lambda i: (i, 0))]
        operands = [xp]
        for arr in weights_and_biases:
            in_specs.append(pl.BlockSpec(arr.shape, lambda i: (0, 0)))
            operands.append(arr)

        wb_bytes = sum(int(a.size) * a.dtype.itemsize
                       for a in weights_and_biases)
        bytes_accessed = (int(xp.size) * xp.dtype.itemsize + wb_bytes
                          + M_pad * out_cols_pad * jnp.dtype(out_dtype).itemsize)

        # VMEM budget: double-buffered x/out tiles + (double-buffered) weight
        # and bias operands + f32 intermediates, with headroom.  Capped at
        # 64 MiB so it stays valid on v7x (64 MiB physical per TC).
        itm = self.compute_dtype.itemsize
        est = (2 * tm * (in_cols_pad + out_cols_pad) * itm
               + 2 * wb_bytes
               + 4 * tm * max(in_cols_pad, out_cols_pad, self.hid_pad) * 4)
        vmem_limit = int(min(max(2 * est, 32 * 1024 * 1024), 64 * 1024 * 1024))

        yp = pl.pallas_call(
            kernel,
            out_shape=jax.ShapeDtypeStruct((M_pad, out_cols_pad), out_dtype),
            grid_spec=pl.GridSpec(
                grid=(M_pad // tm,),
                in_specs=in_specs,
                out_specs=pl.BlockSpec((tm, out_cols_pad), lambda i: (i, 0)),
            ),
            compiler_params=pltpu.CompilerParams(
                dimension_semantics=("parallel",),
                vmem_limit_bytes=vmem_limit),
            cost_estimate=pl.CostEstimate(
                flops=int(flops), transcendentals=0,
                bytes_accessed=int(bytes_accessed)),
        )(*operands)
        return yp

    def forward_front(self, x, tm=512):
        # x: [B, N, in_features] -> [B, N, out_features]
        B, N, C = x.shape
        assert C == self.in_features
        x2d = x.reshape(B * N, C)
        kern = functools.partial(_mlp_front_kernel,
                                 negative_slope=self.negative_slope)
        flops = 2 * B * N * (self.in_features * self.hidden_features
                             + self.hidden_features * self.out_features)
        yp = self._run(kern, x2d,
                       [self._w1t, self._b1, self._w2t, self._b2],
                       self.in_pad, self.out_pad, tm, flops)
        y2d = yp[:B * N, :self.out_features]
        return y2d.reshape(B, N, self.out_features)

    def forward_back(self, x, tm=512):
        # x: [B, N, out_features] -> [B, N, in_features]
        B, N, C = x.shape
        assert C == self.out_features
        x2d = x.reshape(B * N, C)
        kern = functools.partial(_mlp_back_kernel,
                                 inv_negative_slope=self.inv_negative_slope)
        flops = 2 * B * N * (self.out_features * self.hidden_features
                             + self.hidden_features * self.in_features)
        yp = self._run(kern, x2d,
                       [self._b2, self._w2p, self._b1, self._w1p],
                       self.out_pad, self.in_pad, tm, flops)
        y2d = yp[:B * N, :self.in_features]
        return y2d.reshape(B, N, self.in_features)

    def forward(self, front, x):
        return self.forward_front(x) if front else self.forward_back(x)


# ------------------------------ reference (JAX) -----------------------------

def _ref_front(m, x):
    h = x @ m.w1.T + m.b1
    h = jnp.where(h > 0, h, m.negative_slope * h)
    return h @ m.w2.T + m.b2


def _ref_back(m, x):
    h = (x - m.b2[None, None, :]) @ m.w2_pinv
    h = jnp.where(h > 0, h, h / m.negative_slope)
    return (h - m.b1[None, None, :]) @ m.w1_pinv


# ---------------------------------- main ------------------------------------

if __name__ == "__main__":
    key = jax.random.PRNGKey(0)
    k_param, k_x = jax.random.split(key)

    B, N = 2, 8
    in_features, hidden_features, out_features = 32, 64, 32

    mlp = DuplexMlpPallas(in_features, hidden_features, out_features,
                          negative_slope=0.2, key=k_param)

    x = jax.random.normal(k_x, (B, N, in_features), jnp.float32)

    # front pass (standard MLP)
    y_front = jax.block_until_ready(mlp.forward(True, x))
    # back pass (pseudo-inverse mapping); input has out_features channels
    y_back = jax.block_until_ready(mlp.forward(False, y_front))

    # sanity check against plain-JAX reference
    ref_front = _ref_front(mlp, x)
    ref_back = _ref_back(mlp, y_front)
    assert jnp.allclose(y_front, ref_front, rtol=1e-4, atol=1e-4)
    assert jnp.allclose(y_back, ref_back, rtol=1e-4, atol=1e-4)

    print("KERNEL_OK")
</pallas_src>

<mosaic_0001>
module attributes {stable_mosaic.version = 11 : i64} {
  func.func @_mlp_front_kernel(%arg0: i32, %arg1: memref<8x128xf32, #tpu.memory_space<vmem>>, %arg2: memref<128x128xf32, #tpu.memory_space<vmem>>, %arg3: memref<1x128xf32, #tpu.memory_space<vmem>>, %arg4: memref<128x128xf32, #tpu.memory_space<vmem>>, %arg5: memref<1x128xf32, #tpu.memory_space<vmem>>, %arg6: memref<8x128xf32, #tpu.memory_space<vmem>>) attributes {dimension_semantics = [#tpu.dimension_semantics<parallel>], iteration_bounds = array<i64: 2>, scalar_prefetch = 0 : i64, scratch_operands = 0 : i64, tpu.core_type = #tpu.core_type<tc>, window_params = [{transform_indices = @transform_0, window_bounds = array<i64: 8, 128>}, {pipeline_mode = #tpu.pipeline_mode<synchronous>, transform_indices = @transform_1, window_bounds = array<i64: 128, 128>}, {pipeline_mode = #tpu.pipeline_mode<synchronous>, transform_indices = @transform_2, window_bounds = array<i64: 1, 128>}, {pipeline_mode = #tpu.pipeline_mode<synchronous>, transform_indices = @transform_3, window_bounds = array<i64: 128, 128>}, {pipeline_mode = #tpu.pipeline_mode<synchronous>, transform_indices = @transform_4, window_bounds = array<i64: 1, 128>}, {transform_indices = @transform_5, window_bounds = array<i64: 8, 128>}]} {
    %c0 = arith.constant 0 : index
    %c0_0 = arith.constant 0 : index
    %0 = vector.load %arg1[%c0, %c0_0] : memref<8x128xf32, #tpu.memory_space<vmem>>, vector<8x128xf32>
    %c0_1 = arith.constant 0 : index
    %c0_2 = arith.constant 0 : index
    %1 = vector.load %arg2[%c0_1, %c0_2] : memref<128x128xf32, #tpu.memory_space<vmem>>, vector<128x128xf32>
    %cst = arith.constant dense<0.000000e+00> : vector<8x128xf32>
    %2 = tpu.matmul %0, %1, %cst {dimension_numbers = #tpu.dot_dimension_numbers<[1], [0], [0], [1], [0, 0, 1, 1], [], []>} : vector<8x128xf32>, vector<128x128xf32>, vector<8x128xf32> -> vector<8x128xf32>
    %c0_3 = arith.constant 0 : index
    %c0_4 = arith.constant 0 : index
    %3 = vector.load %arg3[%c0_3, %c0_4] : memref<1x128xf32, #tpu.memory_space<vmem>>, vector<1x128xf32>
    %4 = vector.broadcast %3 : vector<1x128xf32> to vector<8x128xf32>
    %5 = arith.addf %2, %4 : vector<8x128xf32>
    %cst_5 = arith.constant 0.000000e+00 : f32
    %6 = vector.broadcast %cst_5 : f32 to vector<8x128xf32>
    %7 = arith.cmpf ogt, %5, %6 : vector<8x128xf32>
    %cst_6 = arith.constant 2.000000e-01 : f32
    %8 = vector.broadcast %cst_6 : f32 to vector<8x128xf32>
    %9 = arith.mulf %8, %5 : vector<8x128xf32>
    %10 = arith.select %7, %5, %9 : vector<8x128xi1>, vector<8x128xf32>
    %c0_7 = arith.constant 0 : index
    %c0_8 = arith.constant 0 : index
    %11 = vector.load %arg4[%c0_7, %c0_8] : memref<128x128xf32, #tpu.memory_space<vmem>>, vector<128x128xf32>
    %cst_9 = arith.constant dense<0.000000e+00> : vector<8x128xf32>
    %12 = tpu.matmul %10, %11, %cst_9 {dimension_numbers = #tpu.dot_dimension_numbers<[1], [0], [0], [1], [0, 0, 1, 1], [], []>} : vector<8x128xf32>, vector<128x128xf32>, vector<8x128xf32> -> vector<8x128xf32>
    %c0_10 = arith.constant 0 : index
    %c0_11 = arith.constant 0 : index
    %13 = vector.load %arg5[%c0_10, %c0_11] : memref<1x128xf32, #tpu.memory_space<vmem>>, vector<1x128xf32>
    %14 = vector.broadcast %13 : vector<1x128xf32> to vector<8x128xf32>
    %15 = arith.addf %12, %14 : vector<8x128xf32>
    %c0_12 = arith.constant 0 : index
    %c0_13 = arith.constant 0 : index
    %16 = vector.load %arg6[%c0_12, %c0_13] : memref<8x128xf32, #tpu.memory_space<vmem>>, vector<8x128xf32>
    tpu.vector_store %arg6[%c0_12, %c0_13], %15 {strides = array<i32>} : memref<8x128xf32, #tpu.memory_space<vmem>>, vector<8x128xf32>,
    return
  }
  func.func @transform_0(%arg0: i32) -> (i32, i32) {
    %c0_i32 = arith.constant 0 : i32
    %c0_i32_0 = arith.constant 0 : i32
    return %arg0, %c0_i32 : i32, i32
  }
  func.func @transform_1(%arg0: i32) -> (i32, i32) {
    %c0_i32 = arith.constant 0 : i32
    %c0_i32_0 = arith.constant 0 : i32
    %c0_i32_1 = arith.constant 0 : i32
    return %c0_i32, %c0_i32_0 : i32, i32
  }
  func.func @transform_2(%arg0: i32) -> (i32, i32) {
    %c0_i32 = arith.constant 0 : i32
    %c0_i32_0 = arith.constant 0 : i32
    %c0_i32_1 = arith.constant 0 : i32
    return %c0_i32, %c0_i32_0 : i32, i32
  }
  func.func @transform_3(%arg0: i32) -> (i32, i32) {
    %c0_i32 = arith.constant 0 : i32
    %c0_i32_0 = arith.constant 0 : i32
    %c0_i32_1 = arith.constant 0 : i32
    return %c0_i32, %c0_i32_0 : i32, i32
  }
  func.func @transform_4(%arg0: i32) -> (i32, i32) {
    %c0_i32 = arith.constant 0 : i32
    %c0_i32_0 = arith.constant 0 : i32
    %c0_i32_1 = arith.constant 0 : i32
    return %c0_i32, %c0_i32_0 : i32, i32
  }
  func.func @transform_5(%arg0: i32) -> (i32, i32) {
    %c0_i32 = arith.constant 0 : i32
    %c0_i32_0 = arith.constant 0 : i32
    return %arg0, %c0_i32 : i32, i32
  }
}

</mosaic_0001>

<bundles_post_ra>
// kernel: tpu_custom_call.1
= control target key start
LH: loop header
LB: loop body
LE: loop exit
PB: predicated region body
PF: predicated region fallthrough
CT: control target
= control target key end

     0   :  { %10 = vsyncpa [#allocation3], 0  ;;  %s906_s0 = inlined_call_operand.hbm [shape: f32[16,128], index: 0, kind: input, shape index: {}]   ;;  %s907_s1 = inlined_call_operand.hbm [shape: f32[128,128], index: 1, kind: input, shape index: {}]   ;;  %s908_s2 = inlined_call_operand.vmem [shape: f32[1,128], index: 2, kind: input, shape index: {}]   ;;  %s909_s3 = inlined_call_operand.hbm [shape: f32[128,128], index: 3, kind: input, shape index: {}]   ;;  %s910_s4 = inlined_call_operand.vmem [shape: f32[1,128], index: 4, kind: input, shape index: {}]   ;;  %s911_s5 = inlined_call_operand.hbm [shape: f32[16,128], index: 5, kind: output, shape index: {}]  }
   0x1   :  { %12 = vsyncpa [#allocation3 + $0x1], 0 }
   0x2   :  { %13 = vsyncpa [#allocation6], 0 }
   0x3   :  { %14 = vsyncpa [#allocation4], 0 }
   0x4   :  { %16 = vsyncpa [#allocation4 + $0x1], 0  ;;  %s748_s18 = smov 0   ;;  %s750_s19 = smov 0  }
   0x5   :  { %s752_s20 = smov 0   ;;  %s754_s21 = smov 0  }
   0x6 LB: > { %s174_s24 = sshll.u32 %s907_s1, 4  ;;  %s772_s25 = sadd.s32 4294967295, %s712_s21   ;;  %s712_s21 = sphi %s754_s21, %s922_s21   ;;  %s708_s20 = sphi %s752_s20, %s921_s20   ;;  %s704_s19 = sphi %s750_s19, %s920_s19   ;;  %s700_s18 = sphi %s748_s18, %s919_s18   ;;  %s175_s24 = int_to_ptr.hbm [resolvable:$true] %s174_s24 }
   0x7   : > { %p466_p0 = scmp.ge.s32.totalorder %s712_s21, 1  ;;  %p43_p1 = scmp.eq.s32.totalorder %s772_s25, 0 }
   0x8   : > { %p163_p2 = scmp.lt.s32.totalorder %s712_s21, 3  ;;  %s714_s27 = smov [#allocation5]  }
   0x9   : > { %s176_s28 = sshll.u32 %s714_s27, 4  ;;  %s191_s6 = sshll.u32 %s909_s3, 4  ;;  %s177_s28 = int_to_ptr.vmem [resolvable:$true] %s176_s28  ;;  %s192_s6 = int_to_ptr.hbm [resolvable:$true] %s191_s6 }
   0xa   : > { %p777_p3 = pnand %p466_p0, %p163_p2  ;;  %s715_s7 = smov [#allocation7]  }
   0xb   : > { %s193_s8 = sshll.u32 %s715_s7, 4  ;;  %s716_s9 = smov 128   ;;  %s194_s8 = int_to_ptr.vmem [resolvable:$true] %s193_s8 }
   0xc   : > { %p493_p4 = pneg %p777_p3  ;;  %s717_s10 = smov 8  }
   0xd   : > { %s465_s11 = sadd.s32 4294967294, %s712_s21   ;;  %s791_s12 = sadd.s32 1, %s712_s21  }
   0xe   : > { %p494_p6 = pnand %p493_p4, %p43_p1  ;;  %s26_s13 = ssub.s32 %s712_s21, %s791_s12 }
   0xf   : > { %s29_s14 = sadd.s32 1, %s708_s20  ;;  %p27_p7 = scmp.eq.s32.totalorder %s26_s13, 0 }
  0x10   : > { %496 = dma.hbm_to_vmem [thread:$0]  (!%p494_p6), %s175_s24, 2048, %s177_s28, [#allocation6], %s716_s9, %s716_s9, %s717_s10  }
  0x11   : > { %499 = dma.hbm_to_vmem [thread:$0]  (!%p494_p6), %s192_s6, 2048, %s194_s8, [#allocation6], %s716_s9, %s716_s9, %s717_s10  }
  0x12   : > { %p36_p8 = scmp.ne.s32.totalorder %s708_s20, %s704_s19  ;;  %p37_p9 = scmp.eq.s32.totalorder %s712_s21, 0 }
  0x13   : > { %p42_p10 = scmp.ne.s32.totalorder %s704_s19, %s700_s18  ;;  %p150_p13 = scmp.eq.s32.totalorder %s772_s25, 1 }
  0x14   : > { %s802_s15 = scalar_select %p27_p7, %s708_s20, %s29_s14  }
  0x15   : > { %p804_p11 = por %p37_p9, %p36_p8  ;;  %p810_p12 = por %p43_p1, %p42_p10 }
  0x16   : > { %p156_p0 = scmp.eq.s32.totalorder %s465_s11, 1  ;;  %p510_p2 = scmp.lt.s32.totalorder %s712_s21, 2 }
  0x17   : > { %s210_s22 = sand.u32 1, %s708_s20   ;;  %p817_p4 = por %p150_p13, %p36_p8 }
  0x18   : > { %p821_p6 = por %p156_p0, %p42_p10  ;;  %s470_s27 = sshll.u32 %s210_s22, 3 }
  0x19   : > { %s471_s28 = sshll.u32 %s712_s21, 3  ;;  %s214_s7 = scalar_lea.vmem [#allocation2], %s470_s27 }
  0x1a   : > { %s218_s6 = scalar_lea.hbm %s906_s0, %s471_s28  ;;  %s222_s8 = sshll.u32 %s214_s7, 4  ;;  %s223_s8 = int_to_ptr.vmem [resolvable:$true] %s222_s8 }
  0x1b   : > { %s220_s9 = sshll.u32 %s218_s6, 4  ;;  %p831_p7 = pnand %p510_p2, %p804_p11  ;;  %s221_s9 = int_to_ptr.hbm [resolvable:$true] %s220_s9 }
  0x1c   : > { %s211_s11 = scalar_lea.sflag [#allocation3], %s210_s22  ;;  %s612_s13 = sshra.s32 %s221_s9, 4  ;;  %s613_s13 = int_to_ptr.hbm [resolvable:$true] %s612_s13 }
  0x1d   : > { %s614_s14 = scalar_lea.hbm %s613_s13, 8  ;;  %p616_p9 = pneg %p831_p7 }
  0x1e   : > { %p615_p8 = scmp.ne.s32.totalorder %s613_s13, %s614_s14  ;;  %s619_s29 = scalar_lea.hbm %s906_s0, 16 }
  0x1f   : > { %p620_p11 = scmp.lt.s32.totalorder %s613_s13, %s906_s0  ;;  %p621_p0 = scmp.lt.s32.totalorder %s619_s29, %s614_s14 }
  0x20   : > { %p617_p10 = pnand %p616_p9, %p615_p8 }
  0x21   : > { %p622_p2 = por %p621_p0, %p620_p11 }
  0x22   : > { %p618_p13 = pneg %p617_p10 }
  0x24   : > { %p623_p5 = pnand %p622_p2, %p618_p13 }
  0x26   : > { %626 = shalt.err (!%p623_p5)
}
  0x27   : > { %503 = dma.hbm_to_vmem [thread:$0]  (!%p831_p7), %s221_s9, 128, %s223_s8, %s211_s11  }
  0x28   : > { %231 = sbr.rel (%p777_p3) target bundleno = 342 (0x156), region = 40  ;;  %s848_s22 = sand.u32 (!%p777_p3), 1, %s704_s19  }
  0x29   : > { %s473_s6 = sshll.u32 (!%p777_p3), %s848_s22, 3  ;;  %s234_s7 = scalar_lea.sflag (!%p777_p3), [#allocation3], %s848_s22 }
  0x2a   : > { %s854_s13 = scalar_lea.vmem (!%p777_p3), [#allocation2], %s473_s6 }
  0x2d   : > { %687 = dma.done.wait (%p810_p12), %s234_s7, 128  }
  0x2e   : > { %689 = vsyncadd (%p810_p12), %s234_s7, 4294967168 }
  0x2f   : > { %691 = dma.done.wait (%p43_p1), [#allocation6], 4096  }
  0x30   : > { %693 = vsyncadd (%p43_p1), [#allocation6], 4294963200  ;;  %v291_v0 = vld [vmem:[#allocation5 + $0x78] sm:$0xff]  ;;  %v290_v1 = vld [vmem:[#allocation5 + $0x70] sm:$0xff]  ;;  %s478_s8 = sshll.u32 %s772_s25, 3  ;;  %s274_s28 = scalar_lea.vmem [#allocation8], %s473_s6 }
  0x31   : > { %296 = vmatpush.msra.mxu0 %v291_v0  ;;  %v289_v2 = vld [vmem:[#allocation5 + $0x68] sm:$0xff]  ;;  %v288_v3 = vld [vmem:[#allocation5 + $0x60] sm:$0xff]  ;;  %v334_v4 = vld [vmem:[#allocation7 + $0x78] sm:$0xff]  ;;  %s371_s11 = scalar_lea.hbm %s911_s5, %s478_s8  ;;  %s373_s29 = sshll.u32 %s274_s28, 4  ;;  %s374_s29 = int_to_ptr.vmem [resolvable:$true] %s373_s29 }
  0x32   : > { %v287_v5 = vld [vmem:[#allocation5 + $0x58] sm:$0xff]  ;;  %339 = vmatpush.msra.mxu1 %v334_v4  ;;  %v333_v6 = vld [vmem:[#allocation7 + $0x70] sm:$0xff]  ;;  %v332_v7 = vld [vmem:[#allocation7 + $0x68] sm:$0xff]  ;;  %s375_s30 = sshll.u32 %s371_s11, 4  ;;  %s361_s16 = scalar_lea.sflag [#allocation4], %s848_s22  ;;  %s376_s30 = int_to_ptr.hbm [resolvable:$true] %s375_s30 }
  0x33   : > { %297 = vmatpush.msra.mxu0 %v290_v1  ;;  %v286_v8 = vld [vmem:[#allocation5 + $0x50] sm:$0xff]  ;;  %v331_v9 = vld [vmem:[#allocation7 + $0x60] sm:$0xff]  ;;  %v285_v10 = vld [vmem:[#allocation5 + $0x48] sm:$0xff]  ;;  %s656_s25 = sshra.s32 %s376_s30, 4  ;;  %s662_s17 = scalar_lea.hbm %s911_s5, 16  ;;  %s657_s25 = int_to_ptr.hbm [resolvable:$true] %s656_s25 }
  0x34   : > { %340 = vmatpush.msra.mxu1 %v333_v6  ;;  %v330_v11 = vld [vmem:[#allocation7 + $0x58] sm:$0xff]  ;;  %v284_v12 = vld [vmem:[#allocation5 + $0x40] sm:$0xff]  ;;  %v329_v13 = vld [vmem:[#allocation7 + $0x50] sm:$0xff]  ;;  %s658_s7 = scalar_lea.hbm %s657_s25, 8  ;;  %p663_p12 = scmp.lt.s32.totalorder %s657_s25, %s911_s5 }
  0x35   : > { %298 = vmatpush.msra.mxu0 %v289_v2  ;;  %v283_v14 = vld [vmem:[#allocation5 + $0x38] sm:$0xff]  ;;  %v328_v15 = vld [vmem:[#allocation7 + $0x48] sm:$0xff]  ;;  %v282_v16 = vld [vmem:[#allocation5 + $0x30] sm:$0xff]  ;;  %p659_p1 = scmp.ne.s32.totalorder %s657_s25, %s658_s7  ;;  %p664_p7 = scmp.lt.s32.totalorder %s662_s17, %s658_s7 }
  0x36   : > { %341 = vmatpush.msra.mxu1 %v332_v7  ;;  %v327_v17 = vld [vmem:[#allocation7 + $0x40] sm:$0xff]  ;;  %v281_v18 = vld [vmem:[#allocation5 + $0x28] sm:$0xff]  ;;  %v326_v19 = vld [vmem:[#allocation7 + $0x38] sm:$0xff] }
  0x37   : > { %299 = vmatpush.msra.mxu0 %v288_v3  ;;  %v280_v20 = vld [vmem:[#allocation5 + $0x20] sm:$0xff]  ;;  %v325_v21 = vld [vmem:[#allocation7 + $0x30] sm:$0xff]  ;;  %v279_v22 = vld [vmem:[#allocation5 + $0x18] sm:$0xff]  ;;  %p660_p3 = pnand %p659_p1, %p817_p4  ;;  %p665_p8 = por %p664_p7, %p663_p12 }
  0x38   : > { %342 = vmatpush.msra.mxu1 %v331_v9  ;;  %v324_v23 = vld [vmem:[#allocation7 + $0x28] sm:$0xff]  ;;  %v278_v24 = vld [vmem:[#allocation5 + $0x10] sm:$0xff]  ;;  %v323_v25 = vld [vmem:[#allocation7 + $0x20] sm:$0xff] }
  0x39   : > { %300 = vmatpush.msra.mxu0 %v287_v5  ;;  %v277_v26 = vld [vmem:[#allocation5 + $0x8] sm:$0xff]  ;;  %v322_v27 = vld [vmem:[#allocation7 + $0x18] sm:$0xff]  ;;  %v276_v28 = vld [vmem:[#allocation5] sm:$0xff]  ;;  %p661_p5 = pneg %p660_p3 }
  0x3a   : > { %343 = vmatpush.msra.mxu1 %v330_v11  ;;  %v275_v29 = vld [vmem:[%s854_s13] sm:$0xff]  ;;  %v320_v31 = vld [vmem:[#allocation7 + $0x8] sm:$0xff]  ;;  %v319_v32 = vld [vmem:[#allocation7] sm:$0xff] }
  0x3b   : > { %301 = vmatpush.msra.mxu0 %v286_v8  ;;  %v321_v30 = vld [vmem:[#allocation7 + $0x10] sm:$0xff]  ;;  %p666_p9 = pnand %p665_p8, %p661_p5 }
  0x3c   : > { %344 = vmatpush.msra.mxu1 %v329_v13  ;;  %v550_v33 = vld [vmem:[%s908_s2] ss:$0 sm:$0xff] }
  0x3d   : > { %302 = vmatpush.msra.mxu0 %v285_v10  ;;  %v551_v38 = vld [vmem:[%s910_s4] ss:$0 sm:$0xff] }
  0x3e   : > { %345 = vmatpush.msra.mxu1 %v328_v15 }
  0x3f   : > { %303 = vmatpush.msra.mxu0 %v284_v12 }
  0x40   : > { %346 = vmatpush.msra.mxu1 %v327_v17 }
  0x41   : > { %304 = vmatpush.msra.mxu0 %v283_v14 }
  0x42   : > { %347 = vmatpush.msra.mxu1 %v326_v19 }
  0x43   : > { %305 = vmatpush.msra.mxu0 %v282_v16 }
  0x44   : > { %348 = vmatpush.msra.mxu1 %v325_v21 }
  0x45   : > { %306 = vmatpush.msra.mxu0 %v281_v18 }
  0x46   : > { %349 = vmatpush.msra.mxu1 %v324_v23 }
  0x47   : > { %307 = vmatpush.msra.mxu0 %v280_v20 }
  0x48   : > { %350 = vmatpush.msra.mxu1 %v323_v25 }
  0x49   : > { %308 = vmatpush.msra.mxu0 %v279_v22 }
  0x4a   : > { %351 = vmatpush.msra.mxu1 %v322_v27 }
  0x4b   : > { %309 = vmatpush.msra.mxu0 %v278_v24 }
  0x4c   : > { %352 = vmatpush.msra.mxu1 %v321_v30 }
  0x4d   : > { %310 = vmatpush.msra.mxu0 %v277_v26 }
  0x4e   : > { %353 = vmatpush.msra.mxu1 %v320_v31 }
  0x4f   : > { %311 = vmatpush.msra.mxu0 %v276_v28 }
  0x50   : > { %312 = vmatmul.f32.vlgmr.msra.gmra.mxu0 %v275_v29  ;;  %354 = vmatpush.msra.mxu1 %v319_v32 }
  0xcd   : > { %v313_v34 = vpop.f32.mrf.mxu0 }
  0xce   : > { %v314_v35 = vadd.f32 %v550_v33, %v313_v34 }
  0xd0   : > { %vm316_vm0 = vcmp.gt.f32.partialorder %v314_v35, 0.0  ;;  %v317_v36 = vmul.f32 0.2, %v314_v35 }
  0xd2   : > { %v318_v37 = vsel %vm316_vm0, %v314_v35, %v317_v36 }
  0xd3   : > { %355 = vmatmul.f32.vlgmr.msra.gmra.mxu1 %v318_v37 }
 0x150   : > { %v356_v39 = vpop.f32.mrf.mxu1 }
 0x151   : > { %v357_v40 = vadd.f32 %v551_v38, %v356_v39 }
 0x153   : > { %359 = vst [vmem:[%s274_s28] sm:$0xff] %v357_v40 }
 0x154   : > { %669 = shalt.err (!%p666_p9)
}
 0x155   : > { %491 = dma.vmem_to_hbm [thread:$0]  (%p817_p4), %s374_s29, 128, %s376_s30, %s361_s16  }
 0x156 PF: > { %s387_s22 = sand.u32 1, %s700_s18   ;;  %p918_p10 = scmp.ge.s32.totalorder %s712_s21, 2 }
 0x157   : > { %s388_s9 = scalar_lea.sflag [#allocation4], %s387_s22 }
 0x158   : > { %p505_p13 = pnand %p918_p10, %p821_p6 }
 0x15a   : > { %p506_p11 = pneg %p505_p13 }
 0x15c   : > { %695 = dma.done.wait (%p506_p11), %s388_s9, 128  }
 0x15d   : > { %697 = vsyncadd (%p506_p11), %s388_s9, 4294967168  ;;  %p19_p0 = scmp.ge.s32.totalorder %s791_s12, 4   ;;  %s919_s18 = smov %s704_s19 }
 0x15e   : > { %s920_s19 = smov %s708_s20  ;;  %s921_s20 = smov %s802_s15 }
 0x15f   : > { %s922_s21 = smov %s791_s12  ;;  %21 = sbr.rel (!%p19_p0) target bundleno = 6 (0x6), region = 93 }
 0x164   :  { %394 = vsyncpa [#allocation3], 1 }
 0x165   :  { %396 = vsyncpa [#allocation3 + $0x1], 1 }
 0x166   :  { %397 = vsyncpa [#allocation6], 1 }
 0x167   :  { %398 = vsyncpa [#allocation4], 1 }
 0x168   :  { %400 = vsyncpa [#allocation4 + $0x1], 1 }

</bundles_post_ra>
